<compile_context>
chip_gen: v7x
topology: tpu7x:2x2x1
jax: 0.10.0
libtpu: 0.0.40
codegen_flags: <defaults>
</compile_context>

<pallas_src>
import jax
import jax.numpy as jnp
from jax import lax
from jax.experimental import pallas as pl
from jax.experimental.pallas import tpu as pltpu

# Small, deterministic hyperparameters consistent with the module's __init__
N_CLASS = 32    # one-hot vocab size
N_HIDDEN = 32   # RNN hidden size
BATCH = 2
T_ENC = 8
T_DEC = 8


def _seq2seq_kernel(enc_in_ref, dec_in_ref, h0_ref,
                    wih_e_ref, whh_e_ref, b_e_ref,
                    wih_d_ref, whh_d_ref, b_d_ref,
                    wfc_ref, bfc_ref,
                    out_ref):
    """Whole seq2seq forward in one kernel invocation.

    enc_in_ref / dec_in_ref : (T*B, C)   time-major rows, flattened
    h0_ref                  : (B, H)
    out_ref                 : (T_dec*B, C)
    """
    f32 = jnp.float32
    b = h0_ref.shape[0]
    t_enc = enc_in_ref.shape[0] // b
    t_dec = dec_in_ref.shape[0] // b

    # ---- hoisted input-side GEMMs (+ bias folded in): one MXU call each,
    #      completely off the serial recurrence chain ----------------------
    enc_pre = (jnp.dot(enc_in_ref[...], wih_e_ref[...],
                       preferred_element_type=f32) + b_e_ref[...])    # (T_enc*B, H)
    dec_pre = (jnp.dot(dec_in_ref[...], wih_d_ref[...],
                       preferred_element_type=f32) + b_d_ref[...])    # (T_dec*B, H)

    whh_e = whh_e_ref[...]
    whh_d = whh_d_ref[...]

    # ---- encoder recurrence: h stays vreg-resident, loop fully unrolled ---
    h = h0_ref[...]                                                   # (B, H)
    for t in range(t_enc):
        h = jnp.tanh(enc_pre[t * b:(t + 1) * b, :]
                     + jnp.dot(h, whh_e, preferred_element_type=f32))

    # ---- decoder recurrence: collect hidden states, apply fc once --------
    hs = []
    for t in range(t_dec):
        h = jnp.tanh(dec_pre[t * b:(t + 1) * b, :]
                     + jnp.dot(h, whh_d, preferred_element_type=f32))
        hs.append(h)

    h_all = jnp.concatenate(hs, axis=0)                               # (T_dec*B, H)
    logits = (jnp.dot(h_all, wfc_ref[...], preferred_element_type=f32)
              + bfc_ref[...])                                         # (T_dec*B, C)
    out_ref[...] = logits.astype(out_ref.dtype)                       # one bulk store


def seq2seq_forward(enc_input, enc_hidden, dec_input, params):
    """Mirrors Seq2Seq.forward(enc_input, enc_hidden, dec_input).

    enc_input / dec_input : (B, T, C)    enc_hidden : (1, B, H)
    Returns (T_dec, B, C), same as the PyTorch forward.
    """
    b, t_enc, c = enc_input.shape
    _, t_dec, _ = dec_input.shape

    # Layout plumbing only (no compute): time-major, then flatten (T, B) rows so the
    # kernel works on lane-dense 2-D slabs and per-step rows are contiguous.
    enc_tm = jnp.transpose(enc_input, (1, 0, 2)).reshape(t_enc * b, c).astype(jnp.float32)
    dec_tm = jnp.transpose(dec_input, (1, 0, 2)).reshape(t_dec * b, c).astype(jnp.float32)
    h0 = enc_hidden[0].astype(jnp.float32)                            # (B, H)

    wih_e = params["enc_w_ih"].T                                      # (C, H)
    whh_e = params["enc_w_hh"].T                                      # (H, H)
    b_e = (params["enc_b_ih"] + params["enc_b_hh"]).reshape(1, -1)    # (1, H)
    wih_d = params["dec_w_ih"].T
    whh_d = params["dec_w_hh"].T
    b_d = (params["dec_b_ih"] + params["dec_b_hh"]).reshape(1, -1)
    wfc = params["fc_w"].T                                            # (H, C)
    bfc = params["fc_b"].reshape(1, -1)                               # (1, C)

    vmem = pl.BlockSpec(memory_space=pltpu.MemorySpace.VMEM)

    out_flat = pl.pallas_call(
        _seq2seq_kernel,
        out_shape=jax.ShapeDtypeStruct((t_dec * b, c), jnp.float32),
        in_specs=[vmem] * 11,
        out_specs=vmem,
    )(enc_tm, dec_tm, h0, wih_e, whh_e, b_e, wih_d, whh_d, b_d, wfc, bfc)

    return out_flat.reshape(t_dec, b, c)


def init_params(key):
    """Deterministic init with PyTorch-style uniform(-1/sqrt(H), 1/sqrt(H))."""
    k = 1.0 / jnp.sqrt(jnp.float32(N_HIDDEN))
    keys = jax.random.split(key, 10)

    def u(kk, shape):
        return jax.random.uniform(kk, shape, jnp.float32, -k, k)

    return {
        # nn.RNN stores weight_ih_l0: (H, C), weight_hh_l0: (H, H), biases: (H,)
        "enc_w_ih": u(keys[0], (N_HIDDEN, N_CLASS)),
        "enc_w_hh": u(keys[1], (N_HIDDEN, N_HIDDEN)),
        "enc_b_ih": u(keys[2], (N_HIDDEN,)),
        "enc_b_hh": u(keys[3], (N_HIDDEN,)),
        "dec_w_ih": u(keys[4], (N_HIDDEN, N_CLASS)),
        "dec_w_hh": u(keys[5], (N_HIDDEN, N_HIDDEN)),
        "dec_b_ih": u(keys[6], (N_HIDDEN,)),
        "dec_b_hh": u(keys[7], (N_HIDDEN,)),
        # nn.Linear stores weight: (n_class, n_hidden), bias: (n_class,)
        "fc_w": u(keys[8], (N_CLASS, N_HIDDEN)),
        "fc_b": u(keys[9], (N_CLASS,)),
    }


def _reference(enc_input, enc_hidden, dec_input, p):
    """Pure-JAX reference of the PyTorch forward (for correctness check)."""
    enc_tm = jnp.transpose(enc_input, (1, 0, 2))
    dec_tm = jnp.transpose(dec_input, (1, 0, 2))
    h = enc_hidden[0]

    def rnn_step(wih, whh, bih, bhh):
        def step(h, x):
            h_new = jnp.tanh(x @ wih.T + bih + h @ whh.T + bhh)
            return h_new, h_new
        return step

    h_enc, _ = lax.scan(rnn_step(p["enc_w_ih"], p["enc_w_hh"],
                                 p["enc_b_ih"], p["enc_b_hh"]), h, enc_tm)
    _, dec_outs = lax.scan(rnn_step(p["dec_w_ih"], p["dec_w_hh"],
                                    p["dec_b_ih"], p["dec_b_hh"]), h_enc, dec_tm)
    return dec_outs @ p["fc_w"].T + p["fc_b"]


if __name__ == "__main__":
    key = jax.random.PRNGKey(0)
    k_p, k_e, k_d = jax.random.split(key, 3)

    params = init_params(k_p)

    # one-hot deterministic inputs (any float input is valid for the RNN)
    enc_ids = jax.random.randint(k_e, (BATCH, T_ENC), 0, N_CLASS)
    dec_ids = jax.random.randint(k_d, (BATCH, T_DEC), 0, N_CLASS)
    enc_input = jax.nn.one_hot(enc_ids, N_CLASS, dtype=jnp.float32)   # (B, T_enc, C)
    dec_input = jax.nn.one_hot(dec_ids, N_CLASS, dtype=jnp.float32)   # (B, T_dec, C)
    enc_hidden = jnp.zeros((1, BATCH, N_HIDDEN), jnp.float32)         # (1, B, H)

    out = seq2seq_forward(enc_input, enc_hidden, dec_input, params)
    out = jax.block_until_ready(out)

    ref = _reference(enc_input, enc_hidden, dec_input, params)
    assert out.shape == (T_DEC, BATCH, N_CLASS)
    assert jnp.allclose(out, ref, atol=1e-4, rtol=1e-4), "mismatch vs JAX reference"

    print("KERNEL_OK")
</pallas_src>

<mosaic_0001>
module attributes {stable_mosaic.version = 11 : i64} {
  func.func @_seq2seq_kernel(%arg0: memref<16x32xf32, #tpu.memory_space<vmem>>, %arg1: memref<16x32xf32, #tpu.memory_space<vmem>>, %arg2: memref<2x32xf32, #tpu.memory_space<vmem>>, %arg3: memref<32x32xf32, #tpu.memory_space<vmem>>, %arg4: memref<32x32xf32, #tpu.memory_space<vmem>>, %arg5: memref<1x32xf32, #tpu.memory_space<vmem>>, %arg6: memref<32x32xf32, #tpu.memory_space<vmem>>, %arg7: memref<32x32xf32, #tpu.memory_space<vmem>>, %arg8: memref<1x32xf32, #tpu.memory_space<vmem>>, %arg9: memref<32x32xf32, #tpu.memory_space<vmem>>, %arg10: memref<1x32xf32, #tpu.memory_space<vmem>>, %arg11: memref<16x32xf32, #tpu.memory_space<vmem>>) attributes {dimension_semantics = [], scalar_prefetch = 0 : i64, scratch_operands = 0 : i64, tpu.core_type = #tpu.core_type<tc>} {
    %c0 = arith.constant 0 : index
    %c0_0 = arith.constant 0 : index
    %0 = vector.load %arg0[%c0, %c0_0] : memref<16x32xf32, #tpu.memory_space<vmem>>, vector<16x32xf32>
    %c0_1 = arith.constant 0 : index
    %c0_2 = arith.constant 0 : index
    %1 = vector.load %arg3[%c0_1, %c0_2] : memref<32x32xf32, #tpu.memory_space<vmem>>, vector<32x32xf32>
    %cst = arith.constant dense<0.000000e+00> : vector<16x32xf32>
    %2 = tpu.matmul %0, %1, %cst {dimension_numbers = #tpu.dot_dimension_numbers<[1], [0], [0], [1], [0, 0, 1, 1], [], []>} : vector<16x32xf32>, vector<32x32xf32>, vector<16x32xf32> -> vector<16x32xf32>
    %c0_3 = arith.constant 0 : index
    %c0_4 = arith.constant 0 : index
    %3 = vector.load %arg5[%c0_3, %c0_4] : memref<1x32xf32, #tpu.memory_space<vmem>>, vector<1x32xf32>
    %4 = vector.broadcast %3 : vector<1x32xf32> to vector<16x32xf32>
    %5 = arith.addf %2, %4 : vector<16x32xf32>
    %c0_5 = arith.constant 0 : index
    %c0_6 = arith.constant 0 : index
    %6 = vector.load %arg1[%c0_5, %c0_6] : memref<16x32xf32, #tpu.memory_space<vmem>>, vector<16x32xf32>
    %c0_7 = arith.constant 0 : index
    %c0_8 = arith.constant 0 : index
    %7 = vector.load %arg6[%c0_7, %c0_8] : memref<32x32xf32, #tpu.memory_space<vmem>>, vector<32x32xf32>
    %cst_9 = arith.constant dense<0.000000e+00> : vector<16x32xf32>
    %8 = tpu.matmul %6, %7, %cst_9 {dimension_numbers = #tpu.dot_dimension_numbers<[1], [0], [0], [1], [0, 0, 1, 1], [], []>} : vector<16x32xf32>, vector<32x32xf32>, vector<16x32xf32> -> vector<16x32xf32>
    %c0_10 = arith.constant 0 : index
    %c0_11 = arith.constant 0 : index
    %9 = vector.load %arg8[%c0_10, %c0_11] : memref<1x32xf32, #tpu.memory_space<vmem>>, vector<1x32xf32>
    %10 = vector.broadcast %9 : vector<1x32xf32> to vector<16x32xf32>
    %11 = arith.addf %8, %10 : vector<16x32xf32>
    %c0_12 = arith.constant 0 : index
    %c0_13 = arith.constant 0 : index
    %12 = vector.load %arg4[%c0_12, %c0_13] : memref<32x32xf32, #tpu.memory_space<vmem>>, vector<32x32xf32>
    %c0_14 = arith.constant 0 : index
    %c0_15 = arith.constant 0 : index
    %13 = vector.load %arg7[%c0_14, %c0_15] : memref<32x32xf32, #tpu.memory_space<vmem>>, vector<32x32xf32>
    %c0_16 = arith.constant 0 : index
    %c0_17 = arith.constant 0 : index
    %14 = vector.load %arg2[%c0_16, %c0_17] : memref<2x32xf32, #tpu.memory_space<vmem>>, vector<2x32xf32>
    %15 = vector.extract_strided_slice %5 {offsets = [0, 0], sizes = [2, 32], strides = [1, 1]} : vector<16x32xf32> to vector<2x32xf32>
    %cst_18 = arith.constant dense<0.000000e+00> : vector<2x32xf32>
    %16 = tpu.matmul %14, %12, %cst_18 {dimension_numbers = #tpu.dot_dimension_numbers<[1], [0], [0], [1], [0, 0, 1, 1], [], []>} : vector<2x32xf32>, vector<32x32xf32>, vector<2x32xf32> -> vector<2x32xf32>
    %17 = arith.addf %15, %16 : vector<2x32xf32>
    %18 = math.tanh %17 : vector<2x32xf32>
    %19 = vector.extract_strided_slice %5 {offsets = [2, 0], sizes = [2, 32], strides = [1, 1]} : vector<16x32xf32> to vector<2x32xf32>
    %cst_19 = arith.constant dense<0.000000e+00> : vector<2x32xf32>
    %20 = tpu.matmul %18, %12, %cst_19 {dimension_numbers = #tpu.dot_dimension_numbers<[1], [0], [0], [1], [0, 0, 1, 1], [], []>} : vector<2x32xf32>, vector<32x32xf32>, vector<2x32xf32> -> vector<2x32xf32>
    %21 = arith.addf %19, %20 : vector<2x32xf32>
    %22 = math.tanh %21 : vector<2x32xf32>
    %23 = vector.extract_strided_slice %5 {offsets = [4, 0], sizes = [2, 32], strides = [1, 1]} : vector<16x32xf32> to vector<2x32xf32>
    %cst_20 = arith.constant dense<0.000000e+00> : vector<2x32xf32>
    %24 = tpu.matmul %22, %12, %cst_20 {dimension_numbers = #tpu.dot_dimension_numbers<[1], [0], [0], [1], [0, 0, 1, 1], [], []>} : vector<2x32xf32>, vector<32x32xf32>, vector<2x32xf32> -> vector<2x32xf32>
    %25 = arith.addf %23, %24 : vector<2x32xf32>
    %26 = math.tanh %25 : vector<2x32xf32>
    %27 = vector.extract_strided_slice %5 {offsets = [6, 0], sizes = [2, 32], strides = [1, 1]} : vector<16x32xf32> to vector<2x32xf32>
    %cst_21 = arith.constant dense<0.000000e+00> : vector<2x32xf32>
    %28 = tpu.matmul %26, %12, %cst_21 {dimension_numbers = #tpu.dot_dimension_numbers<[1], [0], [0], [1], [0, 0, 1, 1], [], []>} : vector<2x32xf32>, vector<32x32xf32>, vector<2x32xf32> -> vector<2x32xf32>
    %29 = arith.addf %27, %28 : vector<2x32xf32>
    %30 = math.tanh %29 : vector<2x32xf32>
    %31 = vector.extract_strided_slice %5 {offsets = [8, 0], sizes = [2, 32], strides = [1, 1]} : vector<16x32xf32> to vector<2x32xf32>
    %cst_22 = arith.constant dense<0.000000e+00> : vector<2x32xf32>
    %32 = tpu.matmul %30, %12, %cst_22 {dimension_numbers = #tpu.dot_dimension_numbers<[1], [0], [0], [1], [0, 0, 1, 1], [], []>} : vector<2x32xf32>, vector<32x32xf32>, vector<2x32xf32> -> vector<2x32xf32>
    %33 = arith.addf %31, %32 : vector<2x32xf32>
    %34 = math.tanh %33 : vector<2x32xf32>
    %35 = vector.extract_strided_slice %5 {offsets = [10, 0], sizes = [2, 32], strides = [1, 1]} : vector<16x32xf32> to vector<2x32xf32>
    %cst_23 = arith.constant dense<0.000000e+00> : vector<2x32xf32>
    %36 = tpu.matmul %34, %12, %cst_23 {dimension_numbers = #tpu.dot_dimension_numbers<[1], [0], [0], [1], [0, 0, 1, 1], [], []>} : vector<2x32xf32>, vector<32x32xf32>, vector<2x32xf32> -> vector<2x32xf32>
    %37 = arith.addf %35, %36 : vector<2x32xf32>
    %38 = math.tanh %37 : vector<2x32xf32>
    %39 = vector.extract_strided_slice %5 {offsets = [12, 0], sizes = [2, 32], strides = [1, 1]} : vector<16x32xf32> to vector<2x32xf32>
    %cst_24 = arith.constant dense<0.000000e+00> : vector<2x32xf32>
    %40 = tpu.matmul %38, %12, %cst_24 {dimension_numbers = #tpu.dot_dimension_numbers<[1], [0], [0], [1], [0, 0, 1, 1], [], []>} : vector<2x32xf32>, vector<32x32xf32>, vector<2x32xf32> -> vector<2x32xf32>
    %41 = arith.addf %39, %40 : vector<2x32xf32>
    %42 = math.tanh %41 : vector<2x32xf32>
    %43 = vector.extract_strided_slice %5 {offsets = [14, 0], sizes = [2, 32], strides = [1, 1]} : vector<16x32xf32> to vector<2x32xf32>
    %cst_25 = arith.constant dense<0.000000e+00> : vector<2x32xf32>
    %44 = tpu.matmul %42, %12, %cst_25 {dimension_numbers = #tpu.dot_dimension_numbers<[1], [0], [0], [1], [0, 0, 1, 1], [], []>} : vector<2x32xf32>, vector<32x32xf32>, vector<2x32xf32> -> vector<2x32xf32>
    %45 = arith.addf %43, %44 : vector<2x32xf32>
    %46 = math.tanh %45 : vector<2x32xf32>
    %47 = vector.extract_strided_slice %11 {offsets = [0, 0], sizes = [2, 32], strides = [1, 1]} : vector<16x32xf32> to vector<2x32xf32>
    %cst_26 = arith.constant dense<0.000000e+00> : vector<2x32xf32>
    %48 = tpu.matmul %46, %13, %cst_26 {dimension_numbers = #tpu.dot_dimension_numbers<[1], [0], [0], [1], [0, 0, 1, 1], [], []>} : vector<2x32xf32>, vector<32x32xf32>, vector<2x32xf32> -> vector<2x32xf32>
    %49 = arith.addf %47, %48 : vector<2x32xf32>
    %50 = math.tanh %49 : vector<2x32xf32>
    %51 = vector.extract_strided_slice %11 {offsets = [2, 0], sizes = [2, 32], strides = [1, 1]} : vector<16x32xf32> to vector<2x32xf32>
    %cst_27 = arith.constant dense<0.000000e+00> : vector<2x32xf32>
    %52 = tpu.matmul %50, %13, %cst_27 {dimension_numbers = #tpu.dot_dimension_numbers<[1], [0], [0], [1], [0, 0, 1, 1], [], []>} : vector<2x32xf32>, vector<32x32xf32>, vector<2x32xf32> -> vector<2x32xf32>
    %53 = arith.addf %51, %52 : vector<2x32xf32>
    %54 = math.tanh %53 : vector<2x32xf32>
    %55 = vector.extract_strided_slice %11 {offsets = [4, 0], sizes = [2, 32], strides = [1, 1]} : vector<16x32xf32> to vector<2x32xf32>
    %cst_28 = arith.constant dense<0.000000e+00> : vector<2x32xf32>
    %56 = tpu.matmul %54, %13, %cst_28 {dimension_numbers = #tpu.dot_dimension_numbers<[1], [0], [0], [1], [0, 0, 1, 1], [], []>} : vector<2x32xf32>, vector<32x32xf32>, vector<2x32xf32> -> vector<2x32xf32>
    %57 = arith.addf %55, %56 : vector<2x32xf32>
    %58 = math.tanh %57 : vector<2x32xf32>
    %59 = vector.extract_strided_slice %11 {offsets = [6, 0], sizes = [2, 32], strides = [1, 1]} : vector<16x32xf32> to vector<2x32xf32>
    %cst_29 = arith.constant dense<0.000000e+00> : vector<2x32xf32>
    %60 = tpu.matmul %58, %13, %cst_29 {dimension_numbers = #tpu.dot_dimension_numbers<[1], [0], [0], [1], [0, 0, 1, 1], [], []>} : vector<2x32xf32>, vector<32x32xf32>, vector<2x32xf32> -> vector<2x32xf32>
    %61 = arith.addf %59, %60 : vector<2x32xf32>
    %62 = math.tanh %61 : vector<2x32xf32>
    %63 = vector.extract_strided_slice %11 {offsets = [8, 0], sizes = [2, 32], strides = [1, 1]} : vector<16x32xf32> to vector<2x32xf32>
    %cst_30 = arith.constant dense<0.000000e+00> : vector<2x32xf32>
    %64 = tpu.matmul %62, %13, %cst_30 {dimension_numbers = #tpu.dot_dimension_numbers<[1], [0], [0], [1], [0, 0, 1, 1], [], []>} : vector<2x32xf32>, vector<32x32xf32>, vector<2x32xf32> -> vector<2x32xf32>
    %65 = arith.addf %63, %64 : vector<2x32xf32>
    %66 = math.tanh %65 : vector<2x32xf32>
    %67 = vector.extract_strided_slice %11 {offsets = [10, 0], sizes = [2, 32], strides = [1, 1]} : vector<16x32xf32> to vector<2x32xf32>
    %cst_31 = arith.constant dense<0.000000e+00> : vector<2x32xf32>
    %68 = tpu.matmul %66, %13, %cst_31 {dimension_numbers = #tpu.dot_dimension_numbers<[1], [0], [0], [1], [0, 0, 1, 1], [], []>} : vector<2x32xf32>, vector<32x32xf32>, vector<2x32xf32> -> vector<2x32xf32>
    %69 = arith.addf %67, %68 : vector<2x32xf32>
    %70 = math.tanh %69 : vector<2x32xf32>
    %71 = vector.extract_strided_slice %11 {offsets = [12, 0], sizes = [2, 32], strides = [1, 1]} : vector<16x32xf32> to vector<2x32xf32>
    %cst_32 = arith.constant dense<0.000000e+00> : vector<2x32xf32>
    %72 = tpu.matmul %70, %13, %cst_32 {dimension_numbers = #tpu.dot_dimension_numbers<[1], [0], [0], [1], [0, 0, 1, 1], [], []>} : vector<2x32xf32>, vector<32x32xf32>, vector<2x32xf32> -> vector<2x32xf32>
    %73 = arith.addf %71, %72 : vector<2x32xf32>
    %74 = math.tanh %73 : vector<2x32xf32>
    %75 = vector.extract_strided_slice %11 {offsets = [14, 0], sizes = [2, 32], strides = [1, 1]} : vector<16x32xf32> to vector<2x32xf32>
    %cst_33 = arith.constant dense<0.000000e+00> : vector<2x32xf32>
    %76 = tpu.matmul %74, %13, %cst_33 {dimension_numbers = #tpu.dot_dimension_numbers<[1], [0], [0], [1], [0, 0, 1, 1], [], []>} : vector<2x32xf32>, vector<32x32xf32>, vector<2x32xf32> -> vector<2x32xf32>
    %77 = arith.addf %75, %76 : vector<2x32xf32>
    %78 = math.tanh %77 : vector<2x32xf32>
    %79 = tpu.concatenate %50, %54, %58, %62, %66, %70, %74, %78 in 0 : vector<2x32xf32>, vector<2x32xf32>, vector<2x32xf32>, vector<2x32xf32>, vector<2x32xf32>, vector<2x32xf32>, vector<2x32xf32>, vector<2x32xf32> -> vector<16x32xf32>
    %c0_34 = arith.constant 0 : index
    %c0_35 = arith.constant 0 : index
    %80 = vector.load %arg9[%c0_34, %c0_35] : memref<32x32xf32, #tpu.memory_space<vmem>>, vector<32x32xf32>
    %cst_36 = arith.constant dense<0.000000e+00> : vector<16x32xf32>
    %81 = tpu.matmul %79, %80, %cst_36 {dimension_numbers = #tpu.dot_dimension_numbers<[1], [0], [0], [1], [0, 0, 1, 1], [], []>} : vector<16x32xf32>, vector<32x32xf32>, vector<16x32xf32> -> vector<16x32xf32>
    %c0_37 = arith.constant 0 : index
    %c0_38 = arith.constant 0 : index
    %82 = vector.load %arg10[%c0_37, %c0_38] : memref<1x32xf32, #tpu.memory_space<vmem>>, vector<1x32xf32>
    %83 = vector.broadcast %82 : vector<1x32xf32> to vector<16x32xf32>
    %84 = arith.addf %81, %83 : vector<16x32xf32>
    %c0_39 = arith.constant 0 : index
    %c0_40 = arith.constant 0 : index
    %85 = vector.load %arg11[%c0_39, %c0_40] : memref<16x32xf32, #tpu.memory_space<vmem>>, vector<16x32xf32>
    tpu.vector_store %arg11[%c0_39, %c0_40], %84 {strides = array<i32>} : memref<16x32xf32, #tpu.memory_space<vmem>>, vector<16x32xf32>,
    return
  }
}

</mosaic_0001>

<bundles_post_ra>
// kernel: tpu_custom_call.1
= control target key start
LH: loop header
LB: loop body
LE: loop exit
PB: predicated region body
PF: predicated region fallthrough
CT: control target
= control target key end

     0   :  { %16 = vsyncpa [#allocation3], 0  ;;  %s2809_s0 = inlined_call_operand.hbm [shape: f32[16,32], index: 0, kind: input, shape index: {}]   ;;  %s2810_s1 = inlined_call_operand.hbm [shape: f32[16,32], index: 1, kind: input, shape index: {}]   ;;  %s2811_s2 = inlined_call_operand.vmem [shape: f32[2,32], index: 2, kind: input, shape index: {}]   ;;  %s2812_s3 = inlined_call_operand.hbm [shape: f32[32,32], index: 3, kind: input, shape index: {}]   ;;  %s2813_s4 = inlined_call_operand.hbm [shape: f32[32,32], index: 4, kind: input, shape index: {}]   ;;  %s2814_s5 = inlined_call_operand.hbm [shape: f32[1,32], index: 5, kind: input, shape index: {}]   ;;  %s2815_s6 = inlined_call_operand.hbm [shape: f32[32,32], index: 6, kind: input, shape index: {}]   ;;  %s2816_s7 = inlined_call_operand.hbm [shape: f32[32,32], index: 7, kind: input, shape index: {}]   ;;  %s2817_s8 = inlined_call_operand.hbm [shape: f32[1,32], index: 8, kind: input, shape index: {}]   ;;  %s2818_s9 = inlined_call_operand.vmem [shape: f32[32,32], index: 9, kind: input, shape index: {}]   ;;  %s2819_s10 = inlined_call_operand.vmem [shape: f32[1,32], index: 10, kind: input, shape index: {}]   ;;  %s2820_s11 = inlined_call_operand.hbm [shape: f32[16,32], index: 11, kind: output, shape index: {}]  }
   0x1   :  { %17 = vsyncpa [#allocation6], 0 }
   0x2   :  { %18 = vsyncpa [#allocation9], 0 }
   0x3   :  { %19 = vsyncpa [#allocation12], 0 }
   0x4   :  { %20 = vsyncpa [#allocation15], 0 }
   0x5   :  { %21 = vsyncpa [#allocation4], 0  ;;  %s2421_s17 = smov [#allocation5]   ;;  %s2422_s19 = smov [#allocation8]  }
   0x6   :  { %s39_s18 = sshll.u32 %s2421_s17, 4  ;;  %s65_s20 = sshll.u32 %s2422_s19, 4  ;;  %s40_s18 = int_to_ptr.vmem [resolvable:$true] %s39_s18  ;;  %s2495_s20 = int_to_ptr.vmem [resolvable:$true] %s65_s20 }
   0x7   :  { %s2211_s23 = scalar_lea.hbm %s2810_s1, 256 }
   0x8   :  { %p2212_p0 = scmp.ne.s32.totalorder %s2810_s1, %s2211_s23  ;;  %p2215_p1 = scmp.lt.u32.totalorder %s2211_s23, %s2810_s1 }
   0xa   :  { %p2217_p2 = pnand %p2215_p1, %p2212_p0 }
   0xc   :  { %2220 = shalt.err (!%p2217_p2)
}
   0xd   :  { %s2221_s28 = scalar_lea.vmem %s40_s18, 256  ;;  %p2226_p4 = scmp.lt.s32.totalorder %s40_s18, %s40_s18 }
   0xe   :  { %p2222_p3 = scmp.ne.s32.totalorder %s40_s18, %s2221_s28  ;;  %p2227_p5 = scmp.lt.s32.totalorder %s2221_s28, %s2221_s28 }
  0x10   :  { %p2228_p6 = por %p2227_p5, %p2226_p4 }
  0x12   :  { %p2229_p7 = pnand %p2228_p6, %p2222_p3 }
  0x14   :  { %2232 = shalt.err (!%p2229_p7)
}
  0x15   :  { %s2423_s29 = smov 128   ;;  %s2424_s30 = smov 8  }
  0x16   :  { %45 = dma.hbm_to_vmem [thread:$0]  %s2810_s1, 256, %s40_s18, [#allocation6], %s2423_s29, %s2423_s29, %s2424_s30  }
  0x17   :  { %s2233_s16 = scalar_lea.hbm %s2813_s4, 512 }
  0x18   :  { %p2234_p8 = scmp.ne.s32.totalorder %s2813_s4, %s2233_s16  ;;  %p2237_p9 = scmp.lt.u32.totalorder %s2233_s16, %s2813_s4 }
  0x1a   :  { %p2239_p10 = pnand %p2237_p9, %p2234_p8 }
  0x1c   :  { %2242 = shalt.err (!%p2239_p10)
}
  0x1d   :  { %s2243_s23 = scalar_lea.vmem %s2495_s20, 512  ;;  %p2248_p12 = scmp.lt.s32.totalorder %s2495_s20, %s2495_s20 }
  0x1e   :  { %p2244_p11 = scmp.ne.s32.totalorder %s2495_s20, %s2243_s23  ;;  %p2249_p13 = scmp.lt.s32.totalorder %s2243_s23, %s2243_s23 }
  0x20   :  { %p2250_p0 = por %p2249_p13, %p2248_p12 }
  0x22   :  { %p2251_p1 = pnand %p2250_p0, %p2244_p11 }
  0x24   :  { %2254 = shalt.err (!%p2251_p1)
}
  0x25   :  { %71 = dma.hbm_to_vmem [thread:$0]  %s2813_s4, 512, %s2495_s20, [#allocation9], %s2423_s29, %s2423_s29, %s2424_s30  }
  0x26   :  { %s2425_s24 = smov [#allocation11]   ;;  %s2426_s26 = smov [#allocation2]  }
  0x27   :  { %s87_s25 = sshll.u32 %s2425_s24, 4  ;;  %s27_s27 = sshll.u32 %s2426_s26, 4  ;;  %s88_s25 = int_to_ptr.vmem [resolvable:$true] %s87_s25  ;;  %s2532_s27 = int_to_ptr.vmem [resolvable:$true] %s27_s27 }
  0x28   :  { %s2255_s13 = scalar_lea.hbm %s2815_s6, 512 }
  0x29   :  { %p2256_p2 = scmp.ne.s32.totalorder %s2815_s6, %s2255_s13  ;;  %p2259_p3 = scmp.lt.u32.totalorder %s2255_s13, %s2815_s6 }
  0x2b   :  { %p2261_p4 = pnand %p2259_p3, %p2256_p2 }
  0x2d   :  { %2264 = shalt.err (!%p2261_p4)
}
  0x2e   :  { %s2265_s4 = scalar_lea.vmem %s88_s25, 512  ;;  %p2270_p6 = scmp.lt.s32.totalorder %s88_s25, %s88_s25 }
  0x2f   :  { %p2266_p5 = scmp.ne.s32.totalorder %s88_s25, %s2265_s4  ;;  %p2271_p7 = scmp.lt.s32.totalorder %s2265_s4, %s2265_s4 }
  0x31   :  { %p2272_p8 = por %p2271_p7, %p2270_p6 }
  0x33   :  { %p2273_p9 = pnand %p2272_p8, %p2266_p5 }
  0x35   :  { %2276 = shalt.err (!%p2273_p9)
}
  0x36   :  { %93 = dma.hbm_to_vmem [thread:$0]  %s2815_s6, 512, %s88_s25, [#allocation12], %s2423_s29, %s2423_s29, %s2424_s30  }
  0x37   :  { %s2277_s23 = scalar_lea.hbm %s2809_s0, 256 }
  0x38   :  { %p2278_p10 = scmp.ne.s32.totalorder %s2809_s0, %s2277_s23  ;;  %p2281_p11 = scmp.lt.u32.totalorder %s2277_s23, %s2809_s0 }
  0x3a   :  { %p2283_p12 = pnand %p2281_p11, %p2278_p10 }
  0x3c   :  { %2286 = shalt.err (!%p2283_p12)
}
  0x3d   :  { %s2287_s28 = scalar_lea.vmem %s2532_s27, 256  ;;  %p2292_p0 = scmp.lt.s32.totalorder %s2532_s27, %s2532_s27 }
  0x3e   :  { %p2288_p13 = scmp.ne.s32.totalorder %s2532_s27, %s2287_s28  ;;  %p2293_p1 = scmp.lt.s32.totalorder %s2287_s28, %s2287_s28 }
  0x40   :  { %p2294_p2 = por %p2293_p1, %p2292_p0 }
  0x42   :  { %p2295_p3 = pnand %p2294_p2, %p2288_p13 }
  0x44   :  { %2298 = shalt.err (!%p2295_p3)
}
  0x45   :  { %33 = dma.hbm_to_vmem [thread:$0]  %s2809_s0, 256, %s2532_s27, [#allocation3], %s2423_s29, %s2423_s29, %s2424_s30  }
  0x46   :  { %s2427_s12 = smov [#allocation7]   ;;  %s2428_s14 = smov [#allocation10]  }
  0x47   :  { %s53_s13 = sshll.u32 %s2427_s12, 4  ;;  %s78_s15 = sshll.u32 %s2428_s14, 4  ;;  %s54_s13 = int_to_ptr.vmem [resolvable:$true] %s53_s13  ;;  %s79_s15 = int_to_ptr.vmem [resolvable:$true] %s78_s15 }
  0x48   :  { %s2299_s4 = scalar_lea.hbm %s2812_s3, 512 }
  0x49   :  { %p2300_p4 = scmp.ne.s32.totalorder %s2812_s3, %s2299_s4  ;;  %p2303_p5 = scmp.lt.u32.totalorder %s2299_s4, %s2812_s3 }
  0x4b   :  { %p2305_p6 = pnand %p2303_p5, %p2300_p4 }
  0x4d   :  { %2308 = shalt.err (!%p2305_p6)
}
  0x4e   :  { %s2309_s0 = scalar_lea.vmem %s54_s13, 512  ;;  %p2314_p8 = scmp.lt.s32.totalorder %s54_s13, %s54_s13 }
  0x4f   :  { %p2310_p7 = scmp.ne.s32.totalorder %s54_s13, %s2309_s0  ;;  %p2315_p9 = scmp.lt.s32.totalorder %s2309_s0, %s2309_s0 }
  0x51   :  { %p2316_p10 = por %p2315_p9, %p2314_p8 }
  0x53   :  { %p2317_p11 = pnand %p2316_p10, %p2310_p7 }
  0x55   :  { %2320 = shalt.err (!%p2317_p11)
}
  0x56   :  { %59 = dma.hbm_to_vmem [thread:$0]  %s2812_s3, 512, %s54_s13, [#allocation6], %s2423_s29, %s2423_s29, %s2424_s30  }
  0x57   :  { %s2321_s24 = scalar_lea.hbm %s2814_s5, 16 }
  0x58   :  { %p2322_p12 = scmp.ne.s32.totalorder %s2814_s5, %s2321_s24  ;;  %p2325_p13 = scmp.lt.u32.totalorder %s2321_s24, %s2814_s5 }
  0x5a   :  { %p2327_p0 = pnand %p2325_p13, %p2322_p12 }
  0x5c   :  { %2330 = shalt.err (!%p2327_p0)
}
  0x5d   :  { %s2331_s12 = scalar_lea.vmem %s79_s15, 16  ;;  %s2335_s14 = scalar_lea.vmem %s79_s15, 32 }
  0x5e   :  { %p2332_p1 = scmp.ne.s32.totalorder %s79_s15, %s2331_s12  ;;  %p2336_p2 = scmp.lt.s32.totalorder %s79_s15, %s79_s15 }
  0x5f   :  { %p2337_p3 = scmp.lt.s32.totalorder %s2335_s14, %s2331_s12 }
  0x61   :  { %p2338_p4 = por %p2337_p3, %p2336_p2 }
  0x63   :  { %p2339_p5 = pnand %p2338_p4, %p2332_p1 }
  0x65   :  { %2342 = shalt.err (!%p2339_p5)
}
  0x66   :  { %81 = dma.hbm_to_vmem [thread:$0]  %s2814_s5, 16, %s79_s15, [#allocation9]  }
  0x67   :  { %s2429_s16 = smov [#allocation13]   ;;  %s2430_s4 = smov [#allocation14]  }
  0x68   :  { %s99_s17 = sshll.u32 %s2429_s16, 4  ;;  %s112_s20 = sshll.u32 %s2430_s4, 4  ;;  %s100_s17 = int_to_ptr.vmem [resolvable:$true] %s99_s17  ;;  %s113_s20 = int_to_ptr.vmem [resolvable:$true] %s112_s20 }
  0x69   :  { %s2343_s22 = scalar_lea.hbm %s2816_s7, 512 }
  0x6a   :  { %p2344_p6 = scmp.ne.s32.totalorder %s2816_s7, %s2343_s22  ;;  %p2347_p7 = scmp.lt.u32.totalorder %s2343_s22, %s2816_s7 }
  0x6c   :  { %p2349_p8 = pnand %p2347_p7, %p2344_p6 }
  0x6e   :  { %2352 = shalt.err (!%p2349_p8)
}
  0x6f   :  { %s2353_s5 = scalar_lea.vmem %s100_s17, 512  ;;  %p2358_p10 = scmp.lt.s32.totalorder %s100_s17, %s100_s17 }
  0x70   :  { %p2354_p9 = scmp.ne.s32.totalorder %s100_s17, %s2353_s5  ;;  %p2359_p11 = scmp.lt.s32.totalorder %s2353_s5, %s2353_s5 }
  0x72   :  { %p2360_p12 = por %p2359_p11, %p2358_p10 }
  0x74   :  { %p2361_p13 = pnand %p2360_p12, %p2354_p9 }
  0x76   :  { %2364 = shalt.err (!%p2361_p13)
}
  0x77   :  { %105 = dma.hbm_to_vmem [thread:$0]  %s2816_s7, 512, %s100_s17, [#allocation12], %s2423_s29, %s2423_s29, %s2424_s30  }
  0x78   :  { %s2365_s28 = scalar_lea.hbm %s2817_s8, 16 }
  0x79   :  { %p2366_p0 = scmp.ne.s32.totalorder %s2817_s8, %s2365_s28  ;;  %p2369_p1 = scmp.lt.u32.totalorder %s2365_s28, %s2817_s8 }
  0x7b   :  { %p2371_p2 = pnand %p2369_p1, %p2366_p0 }
  0x7d   :  { %2374 = shalt.err (!%p2371_p2)
}
  0x7e   :  { %s2375_s3 = scalar_lea.vmem %s113_s20, 16  ;;  %s2379_s13 = scalar_lea.vmem %s113_s20, 32 }
  0x7f   :  { %p2376_p3 = scmp.ne.s32.totalorder %s113_s20, %s2375_s3  ;;  %p2380_p4 = scmp.lt.s32.totalorder %s113_s20, %s113_s20 }
  0x80   :  { %p2381_p5 = scmp.lt.s32.totalorder %s2379_s13, %s2375_s3 }
  0x82   :  { %p2382_p6 = por %p2381_p5, %p2380_p4 }
  0x84   :  { %p2383_p7 = pnand %p2382_p6, %p2376_p3 }
  0x86   :  { %2386 = shalt.err (!%p2383_p7)
}
  0x87   :  { %115 = dma.hbm_to_vmem [thread:$0]  %s2817_s8, 16, %s113_s20, [#allocation15]  }
  0x88   :  { %2409 = dma.done.wait [#allocation3], 256  }
  0x89   :  { %2410 = vsyncadd [#allocation3], 4294967040 }
  0x8a   :  { %2411 = dma.done.wait [#allocation6], 768  }
  0x8b   :  { %2412 = vsyncadd [#allocation6], 4294966528 }
  0x8c   :  { %2413 = dma.done.wait [#allocation9], 528  }
  0x8d   :  { %2414 = vsyncadd [#allocation9], 4294966768 }
  0x8e   :  { %2415 = dma.done.wait [#allocation12], 1024  }
  0x8f   :  { %2416 = vsyncadd [#allocation12], 4294966272 }
  0x90   :  { %2417 = dma.done.wait [#allocation15], 16  }
  0x91   :  { %2418 = vsyncadd [#allocation15], 4294967280  ;;  %vm157_vm0 = vcmask 261120   ;;  %v146_v0 = vld [vmem:[#allocation7] sm:$0xff]  ;;  %v147_v1 = vld [vmem:[#allocation7 + $0x8] sm:$0xff]  ;;  %v2431_v11 = vmov 0.0|0.0  }
  0x92   :  { %v148_v2 = vld [vmem:[#allocation7 + $0x10] sm:$0xff]  ;;  %v2045_v3 = vpack.c.bf16 %v147_v1, %v146_v0  ;;  %v149_v4 = vld [vmem:[#allocation7 + $0x18] sm:$0xff]  ;;  %v144_v5 = vld [vmem:[#allocation2] sm:$0xff]  ;;  %vm2432_vm1 = vmmov 0   ;;  %v2433_v15 = vmov 0.0   ;;  %vm1589_vm2 = vcmask 1041408  }
  0x93   :  { %v2049_v6 = vpack.c.bf16 %v149_v4, %v148_v2  ;;  %1844 = vmatprep.mubr.msk.f32.mxu0 %vm157_vm0, %v144_v5  ;;  %v333_v7 = vld [vmem:[#allocation8] sm:$0xff]  ;;  %v334_v8 = vld [vmem:[#allocation8 + $0x8] sm:$0xff]  ;;  %v335_v12 = vld [vmem:[#allocation8 + $0x10] sm:$0xff]  ;;  %vm1591_vm3 = vcmask 1043456   ;;  %vm1593_vm4 = vcmask 1045504  }
  0x94   :  { %2046 = vmatprep.subr.bf16.mxu0 %v2045_v3  ;;  %v145_v9 = vld [vmem:[#allocation2 + $0x8] sm:$0xff]  ;;  %v2624_v10 = vpack.c.bf16 %v334_v8, %v333_v7  ;;  %v336_v13 = vld [vmem:[#allocation8 + $0x18] sm:$0xff]  ;;  %v341_v16 = vld [vmem:[%s2811_s2] sm:$0x3] }
  0x95   :  { %2048 = vmatpush3.bf16.msra.mxu0 %v2045_v3  ;;  %v2629_v14 = vpack.c.bf16 %v336_v13, %v335_v12  ;;  %v241_v17 = vld [vmem:[#allocation11] sm:$0xff]  ;;  %v242_v18 = vld [vmem:[#allocation11 + $0x8] sm:$0xff]  ;;  %v243_v20 = vld [vmem:[#allocation11 + $0x10] sm:$0xff] }
  0x96   :  { %2050 = vmatprep.subr.bf16.mxu0 %v2049_v6  ;;  %v2053_v19 = vpack.c.bf16 %v242_v18, %v241_v17  ;;  %v244_v21 = vld [vmem:[#allocation11 + $0x18] sm:$0xff]  ;;  %v239_v23 = vld [vmem:[#allocation5] sm:$0xff]  ;;  %v2664_v34 = vld [vmem:[#allocation14] ss:$0 sm:$0xff] }
  0x97   :  { %v2057_v22 = vpack.c.bf16 %v244_v21, %v243_v20  ;;  %v240_v24 = vld [vmem:[#allocation5 + $0x8] sm:$0xff]  ;;  %1855 = vmatprep.mubr.msk.f32.mxu1 %vm157_vm0, %v239_v23  ;;  %v1713_v25 = vld [vmem:[#allocation10] ss:$0 sm:$0xff]  ;;  %v337_v8 = vld [vmem:[#allocation13] sm:$0xff] }
  0x98   :  { %2054 = vmatprep.subr.bf16.mxu1 %v2053_v19  ;;  %v339_v12 = vld [vmem:[#allocation13 + $0x10] sm:$0xff]  ;;  %v340_v13 = vld [vmem:[#allocation13 + $0x18] sm:$0xff] }
  0x99   :  { %2052 = vmatpush3.bf16.msra.mxu0 %v2049_v6  ;;  %2056 = vmatpush3.bf16.msra.mxu1 %v2053_v19 }
  0x9a   :  { %2061 = vmatprep.subr.bf16.mxu0 %v2431_v11  ;;  %2058 = vmatprep.subr.bf16.mxu1 %v2057_v22 }
  0x9c   :  { %1845 = vmatmul.mubr.msk.f32.vlgmr.msra.gmra.mrb[0].mxu0 %vm157_vm0, %v145_v9  ;;  %v338_v9 = vld [vmem:[#allocation13 + $0x8] sm:$0xff] }
  0x9d   :  { %2063 = vmatpush3.bf16.msra.mxu0 %v2624_v10  ;;  %1866 = vmatprep.mubr.msk.f32.mxu0 %vm2432_vm1, %v2433_v15 }
  0x9e   :  { %2064 = vmatprep.subr.bf16.mxu0 %v2431_v11  ;;  %2060 = vmatpush3.bf16.msra.mxu1 %v2057_v22 }
  0x9f   :  { %2067 = vmatprep.subr.bf16.mxu1 %v2431_v11 }
  0xa1   :  { %2066 = vmatpush3.bf16.msra.mxu0 %v2629_v14  ;;  %1856 = vmatmul.mubr.msk.f32.vlgmr.msra.gmra.mrb[0].mxu1 %vm157_vm0, %v240_v24 }
  0xa2   :  { %2073 = vmatprep.subr.bf16.mxu0 %v2431_v11  ;;  %2069 = vmatpush3.bf16.msra.mxu1 %v2624_v10 }
  0xa3   :  { %1877 = vmatprep.mubr.msk.f32.mxu1 %vm2432_vm1, %v2433_v15  ;;  %2070 = vmatprep.subr.bf16.mxu1 %v2431_v11 }
  0xa4   :  { %1867 = vmatmul.mubr.msk.f32.vlgmr.msra.gmra.mrb[2].mxu0 %vm157_vm0, %v341_v16 }
  0xa5   :  { %2075 = vmatpush3.bf16.msra.mxu0 %v2624_v10  ;;  %1888 = vmatprep.mubr.msk.f32.mxu0 %vm2432_vm1, %v2433_v15 }
  0xa6   :  { %2076 = vmatprep.subr.bf16.mxu0 %v2431_v11  ;;  %2072 = vmatpush3.bf16.msra.mxu1 %v2629_v14 }
  0xa7   :  { %2079 = vmatprep.subr.bf16.mxu1 %v2431_v11 }
  0xa9   :  { %2078 = vmatpush3.bf16.msra.mxu0 %v2629_v14 }
  0xaa   :  { %2085 = vmatprep.subr.bf16.mxu0 %v2431_v11 }
 0x16f   :  { %v1846_v26 = vpop.f32.mrb[0].mxu0 }
 0x170   :  { %v2655_v27 = vadd.f32 %v1846_v26, %v1713_v25  ;;  %v230_v28 = vpop.f32.mrb[1].mxu0 }
 0x171   :  { %v231_v29 = vadd.f32 %v1713_v25, %v230_v28 }
 0x174   :  { %v1857_v35 = vpop.f32.mrb[0].mxu1 }
 0x175   :  { %v2667_v36 = vadd.f32 %v1857_v35, %v2664_v34  ;;  %v2669_v37 = vpop.f32.mrb[1].mxu1 }
 0x176   :  { %v325_v22 = vadd.f32 %v2664_v34, %v2669_v37 }
 0x177   :  { %v411_v30 = vpop.f32.mrb[2].mxu0 }
 0x178   :  { %v415_v31 = vadd.f32 %v411_v30, %v231_v29  ;;  %v1868_v32 = vpop.f32.mrb[3].mxu0 }
 0x17a   :  { %2179 = vtanh.f32 %v415_v31 }
 0x184   :  { %v2180_v33 = vpop.eup %2179 }
 0x185   :  { %1878 = vmatmul.mubr.msk.f32.vlgmr.msra.gmra.mrb[2].mxu1 %vm157_vm0, %v2180_v33 }
 0x186   :  { %2081 = vmatpush3.bf16.msra.mxu1 %v2624_v10  ;;  %1899 = vmatprep.mubr.msk.f32.mxu1 %vm2432_vm1, %v2433_v15 }
 0x187   :  { %2082 = vmatprep.subr.bf16.mxu1 %v2431_v11 }
 0x18a   :  { %2084 = vmatpush3.bf16.msra.mxu1 %v2629_v14 }
 0x18b   :  { %2091 = vmatprep.subr.bf16.mxu1 %v2431_v11 }
 0x258   :  { %v486_v38 = vpop.f32.mrb[2].mxu1 }
 0x259   :  { %v491_v39 = vrot.slane %v486_v38, 6  ;;  %v1879_v40 = vpop.f32.mrb[3].mxu1 }
 0x25b   :  { %v493_v41 = vadd.f32 %v491_v39, %v231_v29 }
 0x25d   :  { %2181 = vtanh.f32 %v493_v41 }
 0x267   :  { %v2182_v42 = vpop.eup %2181 }
 0x268   :  { %v496_v43 = vrot.slane %v2182_v42, 2 }
 0x26a   :  { %1889 = vmatmul.mubr.msk.f32.vlgmr.msra.gmra.mrb[4].mxu0 %vm157_vm0, %v496_v43 }
 0x26b   :  { %2087 = vmatpush3.bf16.msra.mxu0 %v2624_v10  ;;  %1910 = vmatprep.mubr.msk.f32.mxu0 %vm2432_vm1, %v2433_v15 }
 0x26c   :  { %2088 = vmatprep.subr.bf16.mxu0 %v2431_v11 }
 0x26f   :  { %2090 = vmatpush3.bf16.msra.mxu0 %v2629_v14 }
 0x270   :  { %2097 = vmatprep.subr.bf16.mxu0 %v2431_v11 }
 0x33d   :  { %v565_v44 = vpop.f32.mrb[4].mxu0 }
 0x33e   :  { %v570_v45 = vrot.slane %v565_v44, 4  ;;  %v1890_v46 = vpop.f32.mrb[5].mxu0 }
 0x340   :  { %v572_v47 = vadd.f32 %v570_v45, %v231_v29 }
 0x342   :  { %2183 = vtanh.f32 %v572_v47 }
 0x34c   :  { %v2184_v48 = vpop.eup %2183 }
 0x34d   :  { %v575_v49 = vrot.slane %v2184_v48, 4 }
 0x34f   :  { %1900 = vmatmul.mubr.msk.f32.vlgmr.msra.gmra.mrb[4].mxu1 %vm157_vm0, %v575_v49 }
 0x350   :  { %2093 = vmatpush3.bf16.msra.mxu1 %v2624_v10  ;;  %1921 = vmatprep.mubr.msk.f32.mxu1 %vm2432_vm1, %v2433_v15 }
 0x351   :  { %2094 = vmatprep.subr.bf16.mxu1 %v2431_v11 }
 0x354   :  { %2096 = vmatpush3.bf16.msra.mxu1 %v2629_v14 }
 0x355   :  { %2103 = vmatprep.subr.bf16.mxu1 %v2431_v11 }
 0x422   :  { %v644_v50 = vpop.f32.mrb[4].mxu1 }
 0x423   :  { %v649_v51 = vrot.slane %v644_v50, 2  ;;  %v1901_v52 = vpop.f32.mrb[5].mxu1 }
 0x425   :  { %v651_v53 = vadd.f32 %v649_v51, %v231_v29 }
 0x427   :  { %2185 = vtanh.f32 %v651_v53 }
 0x431   :  { %v2186_v54 = vpop.eup %2185 }
 0x432   :  { %v654_v55 = vrot.slane %v2186_v54, 6 }
 0x434   :  { %1911 = vmatmul.mubr.msk.f32.vlgmr.msra.gmra.mrb[6].mxu0 %vm157_vm0, %v654_v55 }
 0x435   :  { %2099 = vmatpush3.bf16.msra.mxu0 %v2624_v10  ;;  %1932 = vmatprep.mubr.msk.f32.mxu0 %vm2432_vm1, %v2433_v15 }
 0x436   :  { %2100 = vmatprep.subr.bf16.mxu0 %v2431_v11 }
 0x439   :  { %2102 = vmatpush3.bf16.msra.mxu0 %v2629_v14 }
 0x43a   :  { %2109 = vmatprep.subr.bf16.mxu0 %v2431_v11 }
 0x507   :  { %v723_v56 = vpop.f32.mrb[6].mxu0 }
 0x508   :  { %v727_v57 = vadd.f32 %v723_v56, %v2655_v27  ;;  %v1912_v58 = vpop.f32.mrb[7].mxu0 }
 0x50a   :  { %2187 = vtanh.f32 %v727_v57 }
 0x514   :  { %v2188_v59 = vpop.eup %2187 }
 0x515   :  { %1922 = vmatmul.mubr.msk.f32.vlgmr.msra.gmra.mrb[6].mxu1 %vm157_vm0, %v2188_v59 }
 0x516   :  { %2105 = vmatpush3.bf16.msra.mxu1 %v2624_v10  ;;  %1943 = vmatprep.mubr.msk.f32.mxu1 %vm2432_vm1, %v2433_v15  ;;  %v2708_v10 = vpack.c.bf16 %v338_v9, %v337_v8 }
 0x517   :  { %2106 = vmatprep.subr.bf16.mxu1 %v2431_v11 }
 0x51a   :  { %2108 = vmatpush3.bf16.msra.mxu1 %v2629_v14  ;;  %v2714_v14 = vpack.c.bf16 %v340_v13, %v339_v12 }
 0x51b   :  { %2115 = vmatprep.subr.bf16.mxu1 %v2431_v11 }
 0x5e8   :  { %v798_v60 = vpop.f32.mrb[6].mxu1 }
 0x5e9   :  { %v803_v61 = vrot.slane %v798_v60, 6  ;;  %v1923_v62 = vpop.f32.mrb[7].mxu1 }
 0x5eb   :  { %v805_v63 = vadd.f32 %v803_v61, %v2655_v27 }
 0x5ed   :  { %2189 = vtanh.f32 %v805_v63 }
 0x5f7   :  { %v2190_v0 = vpop.eup %2189 }
 0x5f8   :  { %v808_v1 = vrot.slane %v2190_v0, 2 }
 0x5fa   :  { %1933 = vmatmul.mubr.msk.f32.vlgmr.msra.gmra.mrb[8].mxu0 %vm157_vm0, %v808_v1  ;;  %v1598_v1 = vld [vmem:[%s2818_s9] sm:$0xff] }
 0x5fb   :  { %1954 = vmatprep.mubr.msk.f32.mxu0 %vm2432_vm1, %v2433_v15  ;;  %2111 = vmatpush3.bf16.msra.mxu0 %v2708_v10 }
 0x5fc   :  { %2112 = vmatprep.subr.bf16.mxu0 %v2431_v11 }
 0x5ff   :  { %2114 = vmatpush3.bf16.msra.mxu0 %v2714_v14 }
 0x600   :  { %2121 = vmatprep.subr.bf16.mxu0 %v2431_v11 }
 0x6cd   :  { %v877_v2 = vpop.f32.mrb[8].mxu0 }
 0x6ce   :  { %v882_v3 = vrot.slane %v877_v2, 4  ;;  %v1934_v4 = vpop.f32.mrb[9].mxu0  ;;  %v1599_v2 = vld [vmem:[%s2818_s9 + $0x8] sm:$0xff] }
 0x6cf   :  { %v2157_v4 = vpack.c.bf16 %v1599_v2, %v1598_v1 }
 0x6d0   :  { %v884_v5 = vadd.f32 %v882_v3, %v2655_v27  ;;  %v1600_v3 = vld [vmem:[%s2818_s9 + $0x10] sm:$0xff] }
 0x6d2   :  { %2191 = vtanh.f32 %v884_v5  ;;  %v1601_v5 = vld [vmem:[%s2818_s9 + $0x18] sm:$0xff]  ;;  %s2434_s9 = smov [#allocation16]  }
 0x6d3   :  { %s1697_s5 = sshll.u32 %s2434_s9, 4  ;;  %s1698_s5 = int_to_ptr.vmem [resolvable:$true] %s1697_s5 }
 0x6d4   :  { %s2387_s15 = scalar_lea.vmem %s1698_s5, 256  ;;  %p2392_p9 = scmp.lt.s32.totalorder %s1698_s5, %s1698_s5 }
 0x6d5   :  { %p2388_p8 = scmp.ne.s32.totalorder %s1698_s5, %s2387_s15  ;;  %p2393_p10 = scmp.lt.s32.totalorder %s2387_s15, %s2387_s15 }
 0x6d7   :  { %p2394_p11 = por %p2393_p10, %p2392_p9 }
 0x6d9   :  { %p2395_p12 = pnand %p2394_p11, %p2388_p8 }
 0x6dc   :  { %v2192_v6 = vpop.eup %2191 }
 0x6dd   :  { %v887_v7 = vrot.slane %v2192_v6, 4  ;;  %v2161_v6 = vpack.c.bf16 %v1601_v5, %v1600_v3 }
 0x6df   :  { %1944 = vmatmul.mubr.msk.f32.vlgmr.msra.gmra.mrb[8].mxu1 %vm157_vm0, %v887_v7 }
 0x6e0   :  { %1965 = vmatprep.mubr.msk.f32.mxu1 %vm2432_vm1, %v2433_v15  ;;  %2117 = vmatpush3.bf16.msra.mxu1 %v2708_v10 }
 0x6e1   :  { %2118 = vmatprep.subr.bf16.mxu1 %v2431_v11 }
 0x6e4   :  { %2120 = vmatpush3.bf16.msra.mxu1 %v2714_v14 }
 0x6e5   :  { %2127 = vmatprep.subr.bf16.mxu1 %v2431_v11 }
 0x7b2   :  { %v956_v16 = vpop.f32.mrb[8].mxu1 }
 0x7b3   :  { %v961_v17 = vrot.slane %v956_v16, 2  ;;  %v1945_v18 = vpop.f32.mrb[9].mxu1 }
 0x7b5   :  { %v963_v19 = vadd.f32 %v961_v17, %v2655_v27 }
 0x7b7   :  { %2193 = vtanh.f32 %v963_v19 }
 0x7c1   :  { %v2194_v20 = vpop.eup %2193 }
 0x7c2   :  { %v966_v21 = vrot.slane %v2194_v20, 6 }
 0x7c4   :  { %1955 = vmatmul.mubr.msk.f32.vlgmr.msra.gmra.mrb[10].mxu0 %vm157_vm0, %v966_v21 }
 0x7c5   :  { %2123 = vmatpush3.bf16.msra.mxu0 %v2708_v10  ;;  %1976 = vmatprep.mubr.msk.f32.mxu0 %vm2432_vm1, %v2433_v15 }
 0x7c6   :  { %2124 = vmatprep.subr.bf16.mxu0 %v2431_v11 }
 0x7c9   :  { %2126 = vmatpush3.bf16.msra.mxu0 %v2714_v14 }
 0x7ca   :  { %2133 = vmatprep.subr.bf16.mxu0 %v2431_v11 }
 0x897   :  { %v1035_v23 = vpop.f32.mrb[10].mxu0 }
 0x898   :  { %v1039_v24 = vadd.f32 %v1035_v23, %v325_v22  ;;  %v1956_v25 = vpop.f32.mrb[11].mxu0 }
 0x89a   :  { %2195 = vtanh.f32 %v1039_v24 }
 0x8a4   :  { %v2196_v26 = vpop.eup %2195 }
 0x8a5   :  { %1966 = vmatmul.mubr.msk.f32.vlgmr.msra.gmra.mrb[10].mxu1 %vm157_vm0, %v2196_v26 }
 0x8a6   :  { %2129 = vmatpush3.bf16.msra.mxu1 %v2708_v10  ;;  %1987 = vmatprep.mubr.msk.f32.mxu1 %vm2432_vm1, %v2433_v15 }
 0x8a7   :  { %2130 = vmatprep.subr.bf16.mxu1 %v2431_v11 }
 0x8aa   :  { %2132 = vmatpush3.bf16.msra.mxu1 %v2714_v14 }
 0x8ab   :  { %2139 = vmatprep.subr.bf16.mxu1 %v2431_v11 }
 0x978   :  { %v1110_v27 = vpop.f32.mrb[10].mxu1 }
 0x979   :  { %v1115_v28 = vrot.slane %v1110_v27, 6  ;;  %v1967_v29 = vpop.f32.mrb[11].mxu1 }
 0x97b   :  { %v1117_v30 = vadd.f32 %v1115_v28, %v325_v22 }
 0x97d   :  { %2197 = vtanh.f32 %v1117_v30 }
 0x987   :  { %v2198_v31 = vpop.eup %2197 }
 0x988   :  { %v1120_v32 = vrot.slane %v2198_v31, 2  ;;  %v1590_v39 = vsel %vm1589_vm2, %v2196_v26, %v2198_v31 }
 0x98a   :  { %1977 = vmatmul.mubr.msk.f32.vlgmr.msra.gmra.mrb[12].mxu0 %vm157_vm0, %v1120_v32 }
 0x98b   :  { %2135 = vmatpush3.bf16.msra.mxu0 %v2708_v10  ;;  %1998 = vmatprep.mubr.msk.f32.mxu0 %vm2432_vm1, %v2433_v15 }
 0x98c   :  { %2136 = vmatprep.subr.bf16.mxu0 %v2431_v11 }
 0x98f   :  { %2138 = vmatpush3.bf16.msra.mxu0 %v2714_v14 }
 0x990   :  { %2145 = vmatprep.subr.bf16.mxu0 %v2431_v11 }
 0xa5d   :  { %v1189_v33 = vpop.f32.mrb[12].mxu0 }
 0xa5e   :  { %v1194_v34 = vrot.slane %v1189_v33, 4  ;;  %v1978_v35 = vpop.f32.mrb[13].mxu0 }
 0xa60   :  { %v1196_v37 = vadd.f32 %v1194_v34, %v325_v22 }
 0xa62   :  { %2199 = vtanh.f32 %v1196_v37 }
 0xa6c   :  { %v2200_v38 = vpop.eup %2199 }
 0xa6d   :  { %v1199_v40 = vrot.slane %v2200_v38, 4  ;;  %v1592_v41 = vsel %vm1591_vm3, %v1590_v39, %v2200_v38 }
 0xa6f   :  { %1988 = vmatmul.mubr.msk.f32.vlgmr.msra.gmra.mrb[12].mxu1 %vm157_vm0, %v1199_v40 }
 0xa70   :  { %2141 = vmatpush3.bf16.msra.mxu1 %v2708_v10  ;;  %2009 = vmatprep.mubr.msk.f32.mxu1 %vm2432_vm1, %v2433_v15 }
 0xa71   :  { %2142 = vmatprep.subr.bf16.mxu1 %v2431_v11 }
 0xa74   :  { %2144 = vmatpush3.bf16.msra.mxu1 %v2714_v14 }
 0xa75   :  { %2151 = vmatprep.subr.bf16.mxu1 %v2431_v11 }
 0xb42   :  { %v1268_v42 = vpop.f32.mrb[12].mxu1 }
 0xb43   :  { %v1273_v43 = vrot.slane %v1268_v42, 2  ;;  %v1989_v44 = vpop.f32.mrb[13].mxu1 }
 0xb45   :  { %v1275_v45 = vadd.f32 %v1273_v43, %v325_v22 }
 0xb47   :  { %2201 = vtanh.f32 %v1275_v45 }
 0xb51   :  { %v2202_v46 = vpop.eup %2201 }
 0xb52   :  { %v1278_v47 = vrot.slane %v2202_v46, 6  ;;  %v1594_v48 = vsel %vm1593_vm4, %v1592_v41, %v2202_v46 }
 0xb54   :  { %1999 = vmatmul.mubr.msk.f32.vlgmr.msra.gmra.mrb[14].mxu0 %vm157_vm0, %v1278_v47 }
 0xb55   :  { %2147 = vmatpush3.bf16.msra.mxu0 %v2708_v10  ;;  %2020 = vmatprep.mubr.msk.f32.mxu0 %vm2432_vm1, %v2433_v15 }
 0xb56   :  { %2148 = vmatprep.subr.bf16.mxu0 %v2431_v11 }
 0xb59   :  { %2150 = vmatpush3.bf16.msra.mxu0 %v2714_v14 }
 0xb5a   :  { %2158 = vmatprep.subr.bf16.mxu0 %v2157_v4 }
 0xc27   :  { %v1347_v49 = vpop.f32.mrb[14].mxu0 }
 0xc28   :  { %v1351_v50 = vadd.f32 %v1347_v49, %v2667_v36  ;;  %v2000_v51 = vpop.f32.mrb[15].mxu0 }
 0xc2a   :  { %2203 = vtanh.f32 %v1351_v50 }
 0xc34   :  { %v2204_v52 = vpop.eup %2203 }
 0xc35   :  { %2010 = vmatmul.mubr.msk.f32.vlgmr.msra.gmra.mrb[14].mxu1 %vm157_vm0, %v2204_v52 }
 0xc36   :  { %2153 = vmatpush3.bf16.msra.mxu1 %v2708_v10  ;;  %2031 = vmatprep.mubr.msk.f32.mxu1 %vm2432_vm1, %v2433_v15 }
 0xc37   :  { %2154 = vmatprep.subr.bf16.mxu1 %v2431_v11 }
 0xc3a   :  { %2156 = vmatpush3.bf16.msra.mxu1 %v2714_v14  ;;  %v1735_v14 = vld [vmem:[%s2819_s10] ss:$0 sm:$0xff] }
 0xd08   :  { %v1422_v53 = vpop.f32.mrb[14].mxu1 }
 0xd09   :  { %v1427_v54 = vrot.slane %v1422_v53, 6  ;;  %v2011_v55 = vpop.f32.mrb[15].mxu1 }
 0xd0b   :  { %v1429_v56 = vadd.f32 %v1427_v54, %v2667_v36 }
 0xd0d   :  { %2205 = vtanh.f32 %v1429_v56 }
 0xd17   :  { %v2206_v57 = vpop.eup %2205 }
 0xd18   :  { %v1432_v58 = vrot.slane %v2206_v57, 2  ;;  %v1595_v62 = vsel %vm1589_vm2, %v2204_v52, %v2206_v57 }
 0xd1a   :  { %2021 = vmatmul.mubr.msk.f32.vlgmr.msra.gmra.mrb[16].mxu0 %vm157_vm0, %v1432_v58 }
 0xd1b   :  { %2042 = vmatprep.mubr.msk.f32.mxu0 %vm157_vm0, %v1594_v48  ;;  %2160 = vmatpush3.bf16.msra.mxu0 %v2157_v4 }
 0xd1c   :  { %2162 = vmatprep.subr.bf16.mxu0 %v2161_v6 }
 0xd1f   :  { %2164 = vmatpush3.bf16.msra.mxu0 %v2161_v6 }
 0xded   :  { %v1501_v59 = vpop.f32.mrb[16].mxu0 }
 0xdee   :  { %v1506_v60 = vrot.slane %v1501_v59, 4  ;;  %v2022_v61 = vpop.f32.mrb[17].mxu0 }
 0xdf0   :  { %v1508_v15 = vadd.f32 %v1506_v60, %v2667_v36 }
 0xdf2   :  { %2207 = vtanh.f32 %v1508_v15 }
 0xdfc   :  { %v2208_v11 = vpop.eup %2207 }
 0xdfd   :  { %v1511_v63 = vrot.slane %v2208_v11, 4  ;;  %v1596_v0 = vsel %vm1591_vm3, %v1595_v62, %v2208_v11 }
 0xdff   :  { %2032 = vmatmul.mubr.msk.f32.vlgmr.msra.gmra.mrb[16].mxu1 %vm157_vm0, %v1511_v63 }
 0xed2   :  { %v1580_v7 = vpop.f32.mrb[16].mxu1 }
 0xed3   :  { %v1585_v8 = vrot.slane %v1580_v7, 2  ;;  %v2033_v9 = vpop.f32.mrb[17].mxu1 }
 0xed5   :  { %v1587_v10 = vadd.f32 %v1585_v8, %v2667_v36 }
 0xed7   :  { %2209 = vtanh.f32 %v1587_v10 }
 0xee1   :  { %v2210_v12 = vpop.eup %2209 }
 0xee2   :  { %v1597_v13 = vsel %vm1593_vm4, %v1596_v0, %v2210_v12 }
 0xee3   :  { %2043 = vmatmul.mubr.msk.f32.vlgmr.msra.gmra.mrb[18].mxu0 %vm157_vm0, %v1597_v13 }
 0xfb6   :  { %v2044_v16 = vpop.f32.mrb[18].mxu0 }
 0xfb7   :  { %v1687_v17 = vadd.f32 %v2044_v16, %v1735_v14  ;;  %v1681_v18 = vpop.f32.mrb[19].mxu0 }
 0xfb8   :  { %v1682_v19 = vadd.f32 %v1735_v14, %v1681_v18 }
 0xfb9   :  { %1691 = vst.msk [vmem:[#allocation16 + $0x8] sm:$0xff] %vm157_vm0, %v1687_v17 }
 0xfba   :  { %1690 = vst.msk [vmem:[#allocation16] sm:$0xff] %vm157_vm0, %v1682_v19 }
 0xfbb   :  { %2398 = shalt.err (!%p2395_p12)
}
 0xfbc   :  { %s2399_s24 = scalar_lea.hbm %s2820_s11, 256 }
 0xfbd   :  { %p2400_p13 = scmp.ne.s32.totalorder %s2820_s11, %s2399_s24  ;;  %p2403_p0 = scmp.lt.u32.totalorder %s2399_s24, %s2820_s11 }
 0xfbf   :  { %p2405_p1 = pnand %p2403_p0, %p2400_p13 }
 0xfc1   :  { %2408 = shalt.err (!%p2405_p1)
}
 0xfc2   :  { %1703 = dma.vmem_to_hbm [thread:$0]  %s1698_s5, 256, %s2820_s11, [#allocation4], %s2423_s29, %s2423_s29, %s2424_s30  }
 0xfc3   :  { %2419 = dma.done.wait [#allocation4], 256  }
 0xfc4   :  { %2420 = vsyncadd [#allocation4], 4294967040 }
 0xfc5   :  { %1707 = vsyncpa [#allocation3], 1 }
 0xfc6   :  { %1708 = vsyncpa [#allocation6], 1 }
 0xfc7   :  { %1709 = vsyncpa [#allocation9], 1 }
 0xfc8   :  { %1710 = vsyncpa [#allocation12], 1 }
 0xfc9   :  { %1711 = vsyncpa [#allocation15], 1 }
 0xfca   :  { %1712 = vsyncpa [#allocation4], 1 }

</bundles_post_ra>
